<compile_context>
chip_gen: v5e
topology: v5e:2x2
jax: 0.10.0
libtpu: 0.0.40
codegen_flags: <defaults>
</compile_context>

<pallas_src>
import functools

import jax
import jax.numpy as jnp
from jax import lax
from jax.experimental import pallas as pl
from jax.experimental.pallas import tpu as pltpu


def _silu(v):
    # silu(v) = v * sigmoid(v); sigmoid(v) = 0.5 * (1 + tanh(0.5 v)) -> one EUP op.
    return v * (0.5 * (1.0 + jnp.tanh(0.5 * v)))


def _laurent_kernel(x_ref, w0_ref, b0_ref, w1_ref, b1_ref, w2_ref, b2_ref, o_ref,
                    *, min_radius, max_radius, min_degree, max_degree, n_powers):
    # x_ref: (1, TN) radii; weights pre-transposed to (fan_out, fan_in); biases as
    # (fan_out, 1) columns; o_ref: (out_dim, TN). `c` is already folded into w0.
    tn = x_ref.shape[1]
    p_pad = w0_ref.shape[1]                                   # fan-in of W0, padded to 8k

    r = jnp.clip(x_ref[...], min_radius, max_radius)          # (1, TN)
    r_inv = 1.0 / r                                           # exact divide (r > 0 after clamp)

    # Laurent basis r^d for d = min_degree..max_degree, built lane-dense as a single
    # (P_pad, TN) block via binary exponentiation.  Row i carries degree min_degree+i
    # (padding rows and the degree-0 row resolve to 1.0; their W0 columns are zero /
    # the degree-0 contribution was folded into b0 on the host).
    row = lax.broadcasted_iota(jnp.int32, (p_pad, tn), 0)
    deg = jnp.where(row < n_powers, row + min_degree, 0)
    exp = jnp.abs(deg)
    base = jnp.where(deg < 0,
                     jnp.broadcast_to(r_inv, (p_pad, tn)),
                     jnp.broadcast_to(r, (p_pad, tn)))
    feats = jnp.ones((p_pad, tn), jnp.float32)
    pw = base
    nbits = max(abs(min_degree), abs(max_degree)).bit_length()
    for b in range(nbits):
        take = ((exp >> b) & 1) == 1
        feats = feats * jnp.where(take, pw, 1.0)
        if b + 1 < nbits:
            pw = pw * pw

    def mm(w, v):
        return jnp.dot(w, v, preferred_element_type=jnp.float32)

    # FC: L=2 hidden layers of width h (silu), then linear readout (all lane-dense).
    h0 = _silu(mm(w0_ref[...], feats) + b0_ref[...])          # (h, TN)
    h1 = _silu(mm(w1_ref[...], h0) + b1_ref[...])             # (h, TN)
    out = mm(w2_ref[...], h1) + b2_ref[...]                   # (out_dim, TN)
    o_ref[...] = out.astype(o_ref.dtype)


def laurent_polynomial_forward(x, params, *, min_radius, max_radius,
                               min_degree, max_degree, tile_n=None,
                               transposed_output=False):
    """x: (N,) float32 radii. Returns (N, out_dim), or (out_dim, N) if transposed_output."""
    assert min_radius > 0.0 and max_radius > min_radius
    assert min_degree <= 0 <= max_degree and max_degree - min_degree >= 1
    powers, c, w0, b0, w1, b1, w2, b2 = params
    del powers  # integer degrees are reconstructed from (min_degree, max_degree)
    c, w0, b0 = jnp.asarray(c), jnp.asarray(w0), jnp.asarray(b0)
    w1, b1, w2, b2 = jnp.asarray(w1), jnp.asarray(b1), jnp.asarray(w2), jnp.asarray(b2)

    N = x.shape[0]
    P = c.shape[1]
    h = w0.shape[1]
    out_dim = w2.shape[1]
    assert P == max_degree - min_degree + 1

    def round_up(v, m):
        return -(-v // m) * m

    if tile_n is None:
        # Large tiles amortize per-step pipeline overhead; cap so the grid keeps
        # >= 2 parallel steps (v7x dual TensorCore).
        tile_n = max(128, min(8192, round_up(pl.cdiv(N, 2), 128)))
    else:
        tile_n = max(128, round_up(int(tile_n), 128))

    # Pad rows to a multiple of tile_n (padded radii are finite -> no NaNs; dropped after).
    n_pad = (-N) % tile_n
    if n_pad:
        x = jnp.concatenate([x, jnp.full((n_pad,), max_radius, x.dtype)])
    Np = N + n_pad

    # Transposed host-side layout: N on the lane axis, weights as (fan_out, fan_in).
    x_row = x.reshape(1, Np).astype(jnp.float32)

    # Fold c into W0's columns, fold the degree-0 (constant) basis row into b0, and
    # zero-pad W0's fan-in to a multiple of 8 so the first matmul sees a clean K=8k operand.
    P_pad = max(8, round_up(P, 8))
    w0t = (w0.T * c.reshape(1, P)).astype(jnp.float32)                  # (h, P)
    p0 = -min_degree                                                    # index of degree 0
    b0c = (b0.reshape(h, 1) + w0t[:, p0:p0 + 1]).astype(jnp.float32)    # fold constant row
    zero_mask = (jnp.arange(P) != p0).astype(jnp.float32).reshape(1, P)
    w0t = jnp.pad(w0t * zero_mask, ((0, 0), (0, P_pad - P)))            # (h, P_pad)
    w1t, b1c = w1.T.astype(jnp.float32), b1.reshape(h, 1).astype(jnp.float32)
    w2t, b2c = w2.T.astype(jnp.float32), b2.reshape(out_dim, 1).astype(jnp.float32)

    kernel = functools.partial(
        _laurent_kernel,
        min_radius=float(min_radius), max_radius=float(max_radius),
        min_degree=int(min_degree), max_degree=int(max_degree), n_powers=int(P))

    full = lambda i: (0, 0)
    grid_spec = pltpu.PrefetchScalarGridSpec(
        num_scalar_prefetch=0,
        grid=(Np // tile_n,),
        in_specs=[
            pl.BlockSpec((1, tile_n), lambda i: (0, i)),   # x (lane-dense rows)
            pl.BlockSpec((h, P_pad), full),                # W0^T (c folded in, padded K)
            pl.BlockSpec((h, 1), full),                    # b0 (degree-0 row folded in)
            pl.BlockSpec((h, h), full),                    # W1^T
            pl.BlockSpec((h, 1), full),                    # b1
            pl.BlockSpec((out_dim, h), full),              # W2^T
            pl.BlockSpec((out_dim, 1), full),              # b2
        ],
        out_specs=pl.BlockSpec((out_dim, tile_n), lambda i: (0, i)),
    )

    cost = pl.CostEstimate(
        flops=int(2 * Np * (P_pad * h + h * h + h * out_dim)),
        transcendentals=int(Np * (2 * h + 1)),
        bytes_accessed=int(4 * Np * (1 + out_dim)
                           + 4 * (h * P_pad + h * h + h * out_dim + 2 * h + out_dim)),
    )

    # Rough f32 VMEM footprint: double-buffered x/out tiles + basis temporaries + two
    # (h, tile_n) activations.  Only raise the scoped limit when needed (v5e default 16 MiB).
    vmem_est = 4 * tile_n * (2 * 1 + 2 * out_dim + 3 * P_pad + 3 * h) + (1 << 20)
    compiler_kwargs = dict(dimension_semantics=("parallel",))
    if vmem_est > 12 * 1024 * 1024:
        compiler_kwargs["vmem_limit_bytes"] = int(min(56 * 1024 * 1024, 2 * vmem_est))

    out_t = pl.pallas_call(
        kernel,
        out_shape=jax.ShapeDtypeStruct((out_dim, Np), jnp.float32),
        grid_spec=grid_spec,
        compiler_params=pltpu.CompilerParams(**compiler_kwargs),
        cost_estimate=cost,
    )(x_row, w0t, b0c, w1t, b1c, w2t, b2c)

    out_t = out_t[:, :N]
    if transposed_output:
        # Lane-dense (out_dim, N) layout: avoids an XLA transpose whose HBM traffic
        # exceeds the kernel's own for large N.  Prefer this for fused consumers.
        return out_t
    # Module semantics: (N, out_dim).
    return out_t.T


def make_params(key, *, out_dim, max_radius, min_degree, max_degree, h,
                min_radius=None):
    assert min_degree <= 0 and max_degree >= 0 and max_degree - min_degree >= 1
    P = max_degree - min_degree + 1
    powers = jnp.linspace(min_degree, max_degree, P,
                          dtype=jnp.float32).reshape(1, P)
    if min_radius is None:
        min_radius = max_radius / 1000.0
    assert min_radius > 0.0, "min_radius must be strictly positive"
    cp = 1.0 / jnp.power(max_radius, powers + 1.0)
    cn = 1.0 / jnp.power(min_radius, powers + 1.0)
    c = jnp.minimum(cp, cn).astype(jnp.float32)

    k0, k1, k2 = jax.random.split(key, 3)
    w0 = jax.random.normal(k0, (P, h), jnp.float32) / jnp.sqrt(P)
    b0 = jnp.zeros((1, h), jnp.float32)
    w1 = jax.random.normal(k1, (h, h), jnp.float32) / jnp.sqrt(h)
    b1 = jnp.zeros((1, h), jnp.float32)
    w2 = jax.random.normal(k2, (h, out_dim), jnp.float32) / jnp.sqrt(h)
    b2 = jnp.zeros((1, out_dim), jnp.float32)
    return (powers, c, w0, b0, w1, b1, w2, b2), float(min_radius), float(max_radius)


def _reference(x, params, min_radius, max_radius):
    powers, c, w0, b0, w1, b1, w2, b2 = params
    r = jnp.clip(x, min_radius, max_radius)[:, None]
    feats = jnp.power(r, powers) * c
    h0 = feats @ w0 + b0
    h0 = h0 * jax.nn.sigmoid(h0)
    h1 = h0 @ w1 + b1
    h1 = h1 * jax.nn.sigmoid(h1)
    return h1 @ w2 + b2


if __name__ == "__main__":
    key = jax.random.PRNGKey(0)
    k_param, k_x = jax.random.split(key)

    out_dim, max_radius = 4, 3.5
    min_degree, max_degree = -2, 3        # P = 6
    h = 32                                # L = 2 hidden layers (unrolled in kernel)

    params, min_r, max_r = make_params(
        k_param, out_dim=out_dim, max_radius=max_radius,
        min_degree=min_degree, max_degree=max_degree, h=h,
        min_radius=0.05)

    # N=2048: auto tile_n caps at 1024 -> 2 "parallel" grid steps (both v7x TCs busy).
    N = 2048
    x = jax.random.uniform(k_x, (N,), jnp.float32,
                           minval=0.0, maxval=max_radius * 1.2)

    out = laurent_polynomial_forward(
        x, params, min_radius=min_r, max_radius=max_r,
        min_degree=min_degree, max_degree=max_degree)
    out = jax.block_until_ready(out)

    ref = _reference(x, params, min_r, max_r)
    assert out.shape == (N, out_dim)
    assert jnp.allclose(out, ref, atol=1e-4, rtol=1e-4)
    print("KERNEL_OK")
</pallas_src>

<mosaic_0001>
module attributes {stable_mosaic.version = 11 : i64} {
  func.func @_laurent_kernel(%arg0: i32, %arg1: memref<1x1024xf32, #tpu.memory_space<vmem>>, %arg2: memref<32x8xf32, #tpu.memory_space<vmem>>, %arg3: memref<32x1xf32, #tpu.memory_space<vmem>>, %arg4: memref<32x32xf32, #tpu.memory_space<vmem>>, %arg5: memref<32x1xf32, #tpu.memory_space<vmem>>, %arg6: memref<4x32xf32, #tpu.memory_space<vmem>>, %arg7: memref<4x1xf32, #tpu.memory_space<vmem>>, %arg8: memref<4x1024xf32, #tpu.memory_space<vmem>>) attributes {dimension_semantics = [#tpu.dimension_semantics<parallel>], iteration_bounds = array<i64: 2>, scalar_prefetch = 0 : i64, scratch_operands = 0 : i64, tpu.core_type = #tpu.core_type<tc>, window_params = [{transform_indices = @transform_0, window_bounds = array<i64: 1, 1024>}, {pipeline_mode = #tpu.pipeline_mode<synchronous>, transform_indices = @transform_1, window_bounds = array<i64: 32, 8>}, {pipeline_mode = #tpu.pipeline_mode<synchronous>, transform_indices = @transform_2, window_bounds = array<i64: 32, 1>}, {pipeline_mode = #tpu.pipeline_mode<synchronous>, transform_indices = @transform_3, window_bounds = array<i64: 32, 32>}, {pipeline_mode = #tpu.pipeline_mode<synchronous>, transform_indices = @transform_4, window_bounds = array<i64: 32, 1>}, {pipeline_mode = #tpu.pipeline_mode<synchronous>, transform_indices = @transform_5, window_bounds = array<i64: 4, 32>}, {pipeline_mode = #tpu.pipeline_mode<synchronous>, transform_indices = @transform_6, window_bounds = array<i64: 4, 1>}, {transform_indices = @transform_7, window_bounds = array<i64: 4, 1024>}]} {
    %c0 = arith.constant 0 : index
    %c0_0 = arith.constant 0 : index
    %0 = vector.load %arg1[%c0, %c0_0] : memref<1x1024xf32, #tpu.memory_space<vmem>>, vector<1x1024xf32>
    %cst = arith.constant 5.000000e-02 : f32
    %cst_1 = arith.constant 3.500000e+00 : f32
    %1 = vector.broadcast %cst : f32 to vector<1x1024xf32>
    %2 = arith.maximumf %1, %0 : vector<1x1024xf32>
    %3 = vector.broadcast %cst_1 : f32 to vector<1x1024xf32>
    %4 = arith.minimumf %3, %2 : vector<1x1024xf32>
    %cst_2 = arith.constant 1.000000e+00 : f32
    %5 = vector.broadcast %cst_2 : f32 to vector<1x1024xf32>
    %6 = arith.divf %5, %4 : vector<1x1024xf32>
    %7 = tpu.iota {dimensions = array<i32: 0>} : vector<8x1024xi32>
    %c6_i32 = arith.constant 6 : i32
    %8 = vector.broadcast %c6_i32 : i32 to vector<8x1024xi32>
    %9 = arith.cmpi slt, %7, %8 : vector<8x1024xi32>
    %c-2_i32 = arith.constant -2 : i32
    %10 = vector.broadcast %c-2_i32 : i32 to vector<8x1024xi32>
    %11 = arith.addi %7, %10 : vector<8x1024xi32>
    %c0_i32 = arith.constant 0 : i32
    %12 = vector.broadcast %c0_i32 : i32 to vector<8x1024xi32>
    %13 = arith.select %9, %11, %12 : vector<8x1024xi1>, vector<8x1024xi32>
    %14 = math.absi %13 : vector<8x1024xi32>
    %c0_i32_3 = arith.constant 0 : i32
    %15 = vector.broadcast %c0_i32_3 : i32 to vector<8x1024xi32>
    %16 = arith.cmpi slt, %13, %15 : vector<8x1024xi32>
    %17 = vector.shape_cast %6 : vector<1x1024xf32> to vector<1x1024xf32>
    %18 = vector.broadcast %17 : vector<1x1024xf32> to vector<8x1024xf32>
    %19 = vector.shape_cast %4 : vector<1x1024xf32> to vector<1x1024xf32>
    %20 = vector.broadcast %19 : vector<1x1024xf32> to vector<8x1024xf32>
    %21 = arith.select %16, %18, %20 : vector<8x1024xi1>, vector<8x1024xf32>
    %cst_4 = arith.constant 1.000000e+00 : f32
    %22 = vector.broadcast %cst_4 : f32 to vector<8x1024xf32>
    %c0_i32_5 = arith.constant 0 : i32
    %23 = vector.broadcast %c0_i32_5 : i32 to vector<8x1024xi32>
    %24 = arith.shrsi %14, %23 : vector<8x1024xi32>
    %c1_i32 = arith.constant 1 : i32
    %25 = vector.broadcast %c1_i32 : i32 to vector<8x1024xi32>
    %26 = arith.andi %24, %25 : vector<8x1024xi32>
    %c1_i32_6 = arith.constant 1 : i32
    %27 = vector.broadcast %c1_i32_6 : i32 to vector<8x1024xi32>
    %28 = arith.cmpi eq, %26, %27 : vector<8x1024xi32>
    %cst_7 = arith.constant 1.000000e+00 : f32
    %29 = vector.broadcast %cst_7 : f32 to vector<8x1024xf32>
    %30 = arith.select %28, %21, %29 : vector<8x1024xi1>, vector<8x1024xf32>
    %31 = arith.mulf %22, %30 : vector<8x1024xf32>
    %32 = arith.mulf %21, %21 : vector<8x1024xf32>
    %c1_i32_8 = arith.constant 1 : i32
    %33 = vector.broadcast %c1_i32_8 : i32 to vector<8x1024xi32>
    %34 = arith.shrsi %14, %33 : vector<8x1024xi32>
    %c1_i32_9 = arith.constant 1 : i32
    %35 = vector.broadcast %c1_i32_9 : i32 to vector<8x1024xi32>
    %36 = arith.andi %34, %35 : vector<8x1024xi32>
    %c1_i32_10 = arith.constant 1 : i32
    %37 = vector.broadcast %c1_i32_10 : i32 to vector<8x1024xi32>
    %38 = arith.cmpi eq, %36, %37 : vector<8x1024xi32>
    %cst_11 = arith.constant 1.000000e+00 : f32
    %39 = vector.broadcast %cst_11 : f32 to vector<8x1024xf32>
    %40 = arith.select %38, %32, %39 : vector<8x1024xi1>, vector<8x1024xf32>
    %41 = arith.mulf %31, %40 : vector<8x1024xf32>
    %c0_12 = arith.constant 0 : index
    %c0_13 = arith.constant 0 : index
    %42 = vector.load %arg2[%c0_12, %c0_13] : memref<32x8xf32, #tpu.memory_space<vmem>>, vector<32x8xf32>
    %cst_14 = arith.constant dense<0.000000e+00> : vector<32x1024xf32>
    %43 = tpu.matmul %42, %41, %cst_14 {dimension_numbers = #tpu.dot_dimension_numbers<[1], [0], [0], [1], [0, 0, 1, 1], [], []>} : vector<32x8xf32>, vector<8x1024xf32>, vector<32x1024xf32> -> vector<32x1024xf32>
    %c0_15 = arith.constant 0 : index
    %c0_16 = arith.constant 0 : index
    %44 = vector.load %arg3[%c0_15, %c0_16] : memref<32x1xf32, #tpu.memory_space<vmem>>, vector<32x1xf32>
    %45 = vector.broadcast %44 : vector<32x1xf32> to vector<32x1024xf32>
    %46 = arith.addf %43, %45 : vector<32x1024xf32>
    %cst_17 = arith.constant 5.000000e-01 : f32
    %47 = vector.broadcast %cst_17 : f32 to vector<32x1024xf32>
    %48 = arith.mulf %47, %46 : vector<32x1024xf32>
    %49 = math.tanh %48 : vector<32x1024xf32>
    %cst_18 = arith.constant 1.000000e+00 : f32
    %50 = vector.broadcast %cst_18 : f32 to vector<32x1024xf32>
    %51 = arith.addf %50, %49 : vector<32x1024xf32>
    %cst_19 = arith.constant 5.000000e-01 : f32
    %52 = vector.broadcast %cst_19 : f32 to vector<32x1024xf32>
    %53 = arith.mulf %52, %51 : vector<32x1024xf32>
    %54 = arith.mulf %46, %53 : vector<32x1024xf32>
    %c0_20 = arith.constant 0 : index
    %c0_21 = arith.constant 0 : index
    %55 = vector.load %arg4[%c0_20, %c0_21] : memref<32x32xf32, #tpu.memory_space<vmem>>, vector<32x32xf32>
    %cst_22 = arith.constant dense<0.000000e+00> : vector<32x1024xf32>
    %56 = tpu.matmul %55, %54, %cst_22 {dimension_numbers = #tpu.dot_dimension_numbers<[1], [0], [0], [1], [0, 0, 1, 1], [], []>} : vector<32x32xf32>, vector<32x1024xf32>, vector<32x1024xf32> -> vector<32x1024xf32>
    %c0_23 = arith.constant 0 : index
    %c0_24 = arith.constant 0 : index
    %57 = vector.load %arg5[%c0_23, %c0_24] : memref<32x1xf32, #tpu.memory_space<vmem>>, vector<32x1xf32>
    %58 = vector.broadcast %57 : vector<32x1xf32> to vector<32x1024xf32>
    %59 = arith.addf %56, %58 : vector<32x1024xf32>
    %cst_25 = arith.constant 5.000000e-01 : f32
    %60 = vector.broadcast %cst_25 : f32 to vector<32x1024xf32>
    %61 = arith.mulf %60, %59 : vector<32x1024xf32>
    %62 = math.tanh %61 : vector<32x1024xf32>
    %cst_26 = arith.constant 1.000000e+00 : f32
    %63 = vector.broadcast %cst_26 : f32 to vector<32x1024xf32>
    %64 = arith.addf %63, %62 : vector<32x1024xf32>
    %cst_27 = arith.constant 5.000000e-01 : f32
    %65 = vector.broadcast %cst_27 : f32 to vector<32x1024xf32>
    %66 = arith.mulf %65, %64 : vector<32x1024xf32>
    %67 = arith.mulf %59, %66 : vector<32x1024xf32>
    %c0_28 = arith.constant 0 : index
    %c0_29 = arith.constant 0 : index
    %68 = vector.load %arg6[%c0_28, %c0_29] : memref<4x32xf32, #tpu.memory_space<vmem>>, vector<4x32xf32>
    %cst_30 = arith.constant dense<0.000000e+00> : vector<4x1024xf32>
    %69 = tpu.matmul %68, %67, %cst_30 {dimension_numbers = #tpu.dot_dimension_numbers<[1], [0], [0], [1], [0, 0, 1, 1], [], []>} : vector<4x32xf32>, vector<32x1024xf32>, vector<4x1024xf32> -> vector<4x1024xf32>
    %c0_31 = arith.constant 0 : index
    %c0_32 = arith.constant 0 : index
    %70 = vector.load %arg7[%c0_31, %c0_32] : memref<4x1xf32, #tpu.memory_space<vmem>>, vector<4x1xf32>
    %71 = vector.broadcast %70 : vector<4x1xf32> to vector<4x1024xf32>
    %72 = arith.addf %69, %71 : vector<4x1024xf32>
    %c0_33 = arith.constant 0 : index
    %c0_34 = arith.constant 0 : index
    %73 = vector.load %arg8[%c0_33, %c0_34] : memref<4x1024xf32, #tpu.memory_space<vmem>>, vector<4x1024xf32>
    tpu.vector_store %arg8[%c0_33, %c0_34], %72 {strides = array<i32>} : memref<4x1024xf32, #tpu.memory_space<vmem>>, vector<4x1024xf32>,
    return
  }
  func.func @transform_0(%arg0: i32) -> (i32, i32) {
    %c0_i32 = arith.constant 0 : i32
    %c0_i32_0 = arith.constant 0 : i32
    return %c0_i32, %arg0 : i32, i32
  }
  func.func @transform_1(%arg0: i32) -> (i32, i32) {
    %c0_i32 = arith.constant 0 : i32
    %c0_i32_0 = arith.constant 0 : i32
    %c0_i32_1 = arith.constant 0 : i32
    return %c0_i32, %c0_i32_0 : i32, i32
  }
  func.func @transform_2(%arg0: i32) -> (i32, i32) {
    %c0_i32 = arith.constant 0 : i32
    %c0_i32_0 = arith.constant 0 : i32
    %c0_i32_1 = arith.constant 0 : i32
    return %c0_i32, %c0_i32_0 : i32, i32
  }
  func.func @transform_3(%arg0: i32) -> (i32, i32) {
    %c0_i32 = arith.constant 0 : i32
    %c0_i32_0 = arith.constant 0 : i32
    %c0_i32_1 = arith.constant 0 : i32
    return %c0_i32, %c0_i32_0 : i32, i32
  }
  func.func @transform_4(%arg0: i32) -> (i32, i32) {
    %c0_i32 = arith.constant 0 : i32
    %c0_i32_0 = arith.constant 0 : i32
    %c0_i32_1 = arith.constant 0 : i32
    return %c0_i32, %c0_i32_0 : i32, i32
  }
  func.func @transform_5(%arg0: i32) -> (i32, i32) {
    %c0_i32 = arith.constant 0 : i32
    %c0_i32_0 = arith.constant 0 : i32
    %c0_i32_1 = arith.constant 0 : i32
    return %c0_i32, %c0_i32_0 : i32, i32
  }
  func.func @transform_6(%arg0: i32) -> (i32, i32) {
    %c0_i32 = arith.constant 0 : i32
    %c0_i32_0 = arith.constant 0 : i32
    %c0_i32_1 = arith.constant 0 : i32
    return %c0_i32, %c0_i32_0 : i32, i32
  }
  func.func @transform_7(%arg0: i32) -> (i32, i32) {
    %c0_i32 = arith.constant 0 : i32
    %c0_i32_0 = arith.constant 0 : i32
    return %c0_i32, %arg0 : i32, i32
  }
}

</mosaic_0001>

<bundles_post_ra>
// kernel: tpu_custom_call.1
= control target key start
LH: loop header
LB: loop body
LE: loop exit
PB: predicated region body
PF: predicated region fallthrough
CT: control target
= control target key end

     0   :  { %12 = vsyncpa [#allocation3], 0  ;;  %s2568_s0 = inlined_call_operand.vmem [shape: f32[1,2048], index: 0, kind: input, shape index: {}]   ;;  %s2569_s1 = inlined_call_operand.vmem [shape: f32[32,8], index: 1, kind: input, shape index: {}]   ;;  %s2570_s2 = inlined_call_operand.vmem [shape: f32[32,1], index: 2, kind: input, shape index: {}]   ;;  %s2571_s3 = inlined_call_operand.vmem [shape: f32[32,32], index: 3, kind: input, shape index: {}]   ;;  %s2572_s4 = inlined_call_operand.vmem [shape: f32[32,1], index: 4, kind: input, shape index: {}]   ;;  %s2573_s5 = inlined_call_operand.vmem [shape: f32[4,32], index: 5, kind: input, shape index: {}]   ;;  %s2574_s6 = inlined_call_operand.vmem [shape: f32[4,1], index: 6, kind: input, shape index: {}]   ;;  %s2575_s7 = inlined_call_operand.hbm [shape: f32[4,2048], index: 7, kind: output, shape index: {}]  }
   0x1   :  { %14 = vsyncpa [#allocation3 + $0x1], 0  ;;  %s1878_s24 = smov 0   ;;  %s1880_s25 = smov 0  }
   0x2   :  { %s1882_s26 = smov 0   ;;  %s1884_s27 = smov 0  }
   0x3 LB: > { %s1899_s28 = sadd.s32 4294967295, %s1835_s27   ;;  %s1516_s29 = sadd.s32 4294967294, %s1835_s27   ;;  %s1835_s27 = sphi %s1884_s27, %s2583_s27   ;;  %s1831_s26 = sphi %s1882_s26, %s2582_s26   ;;  %s1827_s25 = sphi %s1880_s25, %s2581_s25   ;;  %s1823_s24 = sphi %s1878_s24, %s2580_s24  }
   0x4   : > { %s1903_s30 = sadd.s32 1, %s1835_s27   ;;  %s179_s8 = sadd.s32 1, %s1831_s26 }
   0x5   : > { %s176_s9 = ssub.s32 %s1835_s27, %s1903_s30  ;;  %p189_p0 = scmp.ne.s32.totalorder %s1831_s26, %s1827_s25 }
   0x6   : > { %p177_p1 = scmp.eq.s32.totalorder %s176_s9, 0  ;;  %p190_p2 = scmp.eq.s32.totalorder %s1899_s28, 1 }
   0x7   : > { %p195_p3 = scmp.ne.s32.totalorder %s1827_s25, %s1823_s24  ;;  %p196_p4 = scmp.eq.s32.totalorder %s1516_s29, 1 }
   0x8   : > { %s1914_s10 = scalar_select %p177_p1, %s1831_s26, %s179_s8  }
   0x9   : > { %p1916_p5 = por %p190_p2, %p189_p0  ;;  %p1920_p6 = por %p196_p4, %p195_p3 }
   0xa   : > { %p1519_p7 = scmp.ge.s32.totalorder %s1835_s27, 1  ;;  %p240_p8 = scmp.lt.s32.totalorder %s1835_s27, 3 }
   0xc   : > { %p241_p9 = pnand %p1519_p7, %p240_p8 }
   0xd   : > { %s1521_s13 = sshll.u32 (!%p241_p9), %s1899_s28, 3  ;;  %s268_s8 = sand.u32 (!%p241_p9), 1, %s1827_s25  }
   0xe   : > { %244 = sbr.rel (%p241_p9) target bundleno = 588 (0x24c), region = 48  ;;  %p272_p10 = scmp.lt.s32.totalorder (!%p241_p9), %s1521_s13, 15 }
   0xf   : > { %s1520_s9 = sshll.u32 (!%p241_p9), %s268_s8, 5  ;;  %s1599_s14 = sshll.u32 (!%p241_p9), %s1899_s28, 5 }
  0x10   : > { %s1455_s17 = scalar_lea.hbm (!%p241_p9), %s2575_s7, %s1599_s14  ;;  %s1444_s20 = scalar_lea.sflag (!%p241_p9), [#allocation3], %s268_s8 }
  0x11   : > { %s1459_s19 = sshll.u32 (!%p241_p9), %s1455_s17, 4  ;;  %s1793_s29 = scalar_lea.hbm (!%p241_p9), %s2575_s7, 64  ;;  %s1460_s19 = int_to_ptr.hbm [resolvable:$true] %s1459_s19 }
  0x12   : > { %s1787_s28 = sshra.s32 (!%p241_p9), %s1460_s19, 4  ;;  %s1788_s28 = int_to_ptr.hbm [resolvable:$true] %s1787_s28 }
  0x13   : > { %v295_v0 = vlaneseq  ;;  %s2585_s13 = smov (!%p272_p10, %s1521_s13), 15  ;;  %v387_v5 = vld [vmem:[%s2570_s2 + $0x8] sm:$0xff]  ;;  %v1837_v6 = vmov 0   ;;  %v386_v10 = vld [vmem:[%s2570_s2] sm:$0xff]  ;;  %v389_v21 = vld [vmem:[%s2570_s2 + $0x18] sm:$0xff]  ;;  %vm410_vm8 = vcmask 64512   ;;  %p1794_p0 = scmp.lt.s32.totalorder %s1788_s28, %s2575_s7 }
  0x14   : > { %s274_s16 = scalar_lea.vmem %s2568_s0, %s2585_s13  ;;  %1641 = vset.pattern.permute.xlu1 %v1837_v6  ;;  %1640 = vset.pattern.permute.xlu0 %v1837_v6  ;;  %v388_v43 = vld [vmem:[%s2570_s2 + $0x10] sm:$0xff]  ;;  %v382_v58 = vld [vmem:[%s2569_s1] sm:$0xff]  ;;  %vm843_vm9 = vcmask 261120   ;;  %vm1430_vm10 = vcmask 1043456   ;;  %s270_s13 = scalar_lea.vmem [#allocation2], %s1520_s9 }
  0x15   : > { %v296_v1 = vshrl.u32 %v295_v0, 7  ;;  %v277_v2 = vld [vmem:[%s274_s16] sm:$0xff]  ;;  %397 = vperm.xlu1 %1641, %v387_v5   ;;  %1642 = vset.pattern.permute.xlu2 %v1837_v6  ;;  %s1457_s18 = sshll.u32 %s270_s13, 4  ;;  %s1789_s21 = scalar_lea.hbm %s1788_s28, 32  ;;  %s1458_s18 = int_to_ptr.vmem [resolvable:$true] %s1457_s18 }
  0x16   : > { %v278_v3 = vmax.f32 %v277_v2, 0.05  ;;  %407 = vperm.xlu0 %1640, %v389_v21   ;;  %p1790_p11 = scmp.ne.s32.totalorder %s1788_s28, %s1789_s21  ;;  %p1795_p1 = scmp.lt.s32.totalorder %s1793_s29, %s1789_s21 }
  0x17   : > { %v298_v4 = vadd.s32 4294967294, %v296_v1  ;;  %vm297_vm0 = vcmp.lt.s32.totalorder %v296_v1, 6 }
  0x18   : > { %v1933_v7 = vmin.f32 %v278_v3, 3.5  ;;  %p1791_p12 = pnand %p1790_p11, %p1916_p5  ;;  %p1796_p2 = por %p1795_p1, %p1794_p0 }
  0x19   : > { %v1936_v8 = vsel %vm297_vm0, %v298_v4, 0 }
  0x1a   : > { %1643 = vrcp.f32 %v1933_v7  ;;  %v301_v9 = vsub.s32 0, %v1936_v8  ;;  %vm300_vm1 = vcmp.lt.s32.totalorder %v1936_v8, 0  ;;  %v291_v14 = vand.u32 2147483648, %v1933_v7  ;;  %p1792_p13 = pneg %p1791_p12 }
  0x1b   : > { %vm285_vm2 = vweird.f32 %v1933_v7  ;;  %v289_v16 = vand.u32 2147483647, %v1933_v7  ;;  %v321_v23 = vperm.slane %v1933_v7, 0  ;;  %v322_v26 = vperm.slane %v1933_v7, 1 }
  0x1c   : > { %v302_v13 = vsel %vm300_vm1, %v301_v9, %v1936_v8  ;;  %v292_v19 = vor.u32 1.1754944e-38, %v291_v14  ;;  %v323_v27 = vperm.slane %v1933_v7, 2  ;;  %v324_v28 = vperm.slane %v1933_v7, 3  ;;  %v383_v8 = vld [vmem:[%s2569_s1 + $0x8] sm:$0xff]  ;;  %p1797_p3 = pnand %p1796_p2, %p1792_p13 }
  0x1d   : > { %392 = vperm.xlu1 %1641, %v386_v10   ;;  %v363_v17 = vshra.s32 %v302_v13, 1  ;;  %v345_v20 = vand.u32 1, %v302_v13  ;;  %vm290_vm5 = vcmp.eq.f32.partialorder %v289_v16, 8.507059e+37  ;;  %v328_v51 = vperm.slane %v1933_v7, 7 }
  0x1e   : > { %402 = vperm.xlu0 %1640, %v388_v43   ;;  %v327_v63 = vperm.slane %v1933_v7, 6  ;;  %v325_v1 = vperm.slane %v1933_v7, 4  ;;  %v326_v3 = vperm.slane %v1933_v7, 5 }
  0x1f   : > { %v1954_v24 = vand.u32 1, %v363_v17  ;;  %vm1959_vm6 = vcmp.eq.s32.totalorder %v345_v20, 1  ;;  %v820_v17 = vld [vmem:[%s2572_s4 + $0x8] sm:$0xff] }
  0x20   : > { %v1644_v11 = vpop.eup %1643 }
  0x21   : > { %v281_v12 = vmul.f32 %v1644_v11, %v1933_v7  ;;  %vm286_vm3 = vweird.f32 %v1644_v11  ;;  %vm365_vm7 = vcmp.eq.s32.totalorder %v1954_v24, 1  ;;  %v384_v24 = vld [vmem:[%s2569_s1 + $0x10] sm:$0xff] }
  0x22   : > { %vm287_vm4 = vmor %vm285_vm2, %vm286_vm3 }
  0x23   : > { %v282_v15 = vsub.f32 1.0, %v281_v12 }
  0x25   : > { %v283_v18 = vmul.f32 %v1644_v11, %v282_v15 }
  0x26   : > { %830 = vperm.xlu0 %1640, %v820_v17  }
  0x27   : > { %v284_v22 = vadd.f32 %v1644_v11, %v283_v18 }
  0x29   : > { %v288_v25 = vsel %vm287_vm4, %v1644_v11, %v284_v22 }
  0x2a   : > { %v293_v29 = vsel %vm290_vm5, %v292_v19, %v288_v25  ;;  %v385_v25 = vld [vmem:[%s2569_s1 + $0x18] sm:$0xff] }
  0x2b   : > { %v304_v31 = vperm.slane %v293_v29, 0  ;;  %v305_v32 = vperm.slane %v293_v29, 1  ;;  %v306_v33 = vperm.slane %v293_v29, 2  ;;  %v307_v34 = vperm.slane %v293_v29, 3 }
  0x2c   : > { %v311_v50 = vperm.slane %v293_v29, 7  ;;  %v310_v60 = vperm.slane %v293_v29, 6  ;;  %v308_v0 = vperm.slane %v293_v29, 4  ;;  %v309_v2 = vperm.slane %v293_v29, 5 }
  0x2d   : > { %v337_v35 = vsel %vm300_vm1, %v304_v31, %v321_v23  ;;  %v338_v36 = vsel %vm300_vm1, %v305_v32, %v322_v26  ;;  %v339_v37 = vsel %vm300_vm1, %v306_v33, %v323_v27  ;;  %v340_v38 = vsel %vm300_vm1, %v307_v34, %v324_v28  ;;  %v819_v23 = vld [vmem:[%s2572_s4] sm:$0xff] }
  0x2e   : > { %v347_v39 = vsel %vm1959_vm6, %v337_v35, 1.0  ;;  %v355_v40 = vmul.f32 %v337_v35, %v337_v35  ;;  %v348_v41 = vsel %vm1959_vm6, %v338_v36, 1.0  ;;  %v356_v42 = vmul.f32 %v338_v36, %v338_v36  ;;  %825 = vperm.xlu1 %1641, %v819_v23  }
  0x2f   : > { %v349_v44 = vsel %vm1959_vm6, %v339_v37, 1.0  ;;  %v357_v45 = vmul.f32 %v339_v37, %v339_v37  ;;  %v350_v46 = vsel %vm1959_vm6, %v340_v38, 1.0  ;;  %v358_v47 = vmul.f32 %v340_v38, %v340_v38 }
  0x30   : > { %v366_v48 = vsel %vm365_vm7, %v355_v40, 1.0  ;;  %v367_v49 = vsel %vm365_vm7, %v356_v42, 1.0  ;;  %v344_v59 = vsel %vm300_vm1, %v311_v50, %v328_v51  ;;  %v343_v5 = vsel %vm300_vm1, %v310_v60, %v327_v63 }
  0x31   : > { %v374_v52 = vmul.f32 %v366_v48, %v347_v39  ;;  %v375_v53 = vmul.f32 %v367_v49, %v348_v41  ;;  %v368_v54 = vsel %vm365_vm7, %v357_v45, 1.0  ;;  %v369_v55 = vsel %vm365_vm7, %v358_v47, 1.0 }
  0x32   : > { %v376_v56 = vmul.f32 %v368_v54, %v349_v44  ;;  %v377_v57 = vmul.f32 %v369_v55, %v350_v46  ;;  %v354_v61 = vsel %vm1959_vm6, %v344_v59, 1.0  ;;  %v362_v62 = vmul.f32 %v344_v59, %v344_v59 }
  0x33   : > { %438 = vmatpush.msra.mxu0 %v374_v52  ;;  %467 = vmatpush.msra.mxu1 %v375_v53  ;;  %v353_v9 = vsel %vm1959_vm6, %v343_v5, 1.0  ;;  %v361_v10 = vmul.f32 %v343_v5, %v343_v5  ;;  %v341_v7 = vsel %vm300_vm1, %v308_v0, %v325_v1  ;;  %v342_v13 = vsel %vm300_vm1, %v309_v2, %v326_v3 }
  0x34   : > { %496 = vmatpush.msra.mxu2 %v376_v56  ;;  %525 = vmatpush.msra.mxu3 %v377_v57  ;;  %v373_v4 = vsel %vm365_vm7, %v362_v62, 1.0  ;;  %v351_v11 = vsel %vm1959_vm6, %v341_v7, 1.0  ;;  %v359_v12 = vmul.f32 %v341_v7, %v341_v7  ;;  %v352_v15 = vsel %vm1959_vm6, %v342_v13, 1.0 }
  0x35   : > { %1522 = vmatmul.msk.f32.vlgmr.msra.gmra.mxu0 %vm410_vm8, %v382_v58  ;;  %1526 = vmatmul.msk.f32.vlgmr.msra.gmra.mxu1 %vm410_vm8, %v382_v58  ;;  %v381_v6 = vmul.f32 %v373_v4, %v354_v61  ;;  %v372_v14 = vsel %vm365_vm7, %v361_v10, 1.0  ;;  %v360_v16 = vmul.f32 %v342_v13, %v342_v13 }
  0x36   : > { %1530 = vmatmul.msk.f32.vlgmr.msra.gmra.mxu2 %vm410_vm8, %v382_v58  ;;  %1534 = vmatmul.msk.f32.vlgmr.msra.gmra.mxu3 %vm410_vm8, %v382_v58  ;;  %v380_v18 = vmul.f32 %v372_v14, %v353_v9  ;;  %v370_v19 = vsel %vm365_vm7, %v359_v12, 1.0 }
  0x37   : > { %641 = vmatpush.msrb.mxu3 %v381_v6  ;;  %v378_v20 = vmul.f32 %v370_v19, %v351_v11  ;;  %v371_v21 = vsel %vm365_vm7, %v360_v16, 1.0 }
  0x38   : > { %612 = vmatpush.msrb.mxu2 %v380_v18  ;;  %v379_v22 = vmul.f32 %v371_v21, %v352_v15 }
  0x39   : > { %554 = vmatpush.msrb.mxu0 %v378_v20 }
  0x3a   : > { %583 = vmatpush.msrb.mxu1 %v379_v22 }
  0x3d   : > { %1523 = vmatmul.msk.f32.gmra.mxu0 %vm410_vm8, %v383_v8  ;;  %1527 = vmatmul.msk.f32.gmra.mxu1 %vm410_vm8, %v383_v8 }
  0x3e   : > { %1531 = vmatmul.msk.f32.gmra.mxu2 %vm410_vm8, %v383_v8  ;;  %1535 = vmatmul.msk.f32.gmra.mxu3 %vm410_vm8, %v383_v8 }
  0x45   : > { %1524 = vmatmul.msk.f32.gmra.mxu0 %vm410_vm8, %v384_v24  ;;  %1528 = vmatmul.msk.f32.gmra.mxu1 %vm410_vm8, %v384_v24 }
  0x46   : > { %1532 = vmatmul.msk.f32.gmra.mxu2 %vm410_vm8, %v384_v24  ;;  %1536 = vmatmul.msk.f32.gmra.mxu3 %vm410_vm8, %v384_v24 }
  0x4d   : > { %1525 = vmatmul.msk.f32.gmra.mxu0 %vm410_vm8, %v385_v25  ;;  %1529 = vmatmul.msk.f32.gmra.mxu1 %vm410_vm8, %v385_v25 }
  0x4e   : > { %1533 = vmatmul.msk.f32.gmra.mxu2 %vm410_vm8, %v385_v25  ;;  %1537 = vmatmul.msk.f32.gmra.mxu3 %vm410_vm8, %v385_v25 }
  0x55   : > { %1538 = vmatmul.msk.f32.vlgmr.msrb.gmra.mxu0 %vm410_vm8, %v382_v58  ;;  %1542 = vmatmul.msk.f32.vlgmr.msrb.gmra.mxu1 %vm410_vm8, %v382_v58 }
  0x56   : > { %1546 = vmatmul.msk.f32.vlgmr.msrb.gmra.mxu2 %vm410_vm8, %v382_v58  ;;  %1550 = vmatmul.msk.f32.vlgmr.msrb.gmra.mxu3 %vm410_vm8, %v382_v58 }
  0x5d   : > { %1539 = vmatmul.msk.f32.gmra.mxu0 %vm410_vm8, %v383_v8  ;;  %1543 = vmatmul.msk.f32.gmra.mxu1 %vm410_vm8, %v383_v8 }
  0x5e   : > { %1547 = vmatmul.msk.f32.gmra.mxu2 %vm410_vm8, %v383_v8  ;;  %1551 = vmatmul.msk.f32.gmra.mxu3 %vm410_vm8, %v383_v8 }
  0x65   : > { %1540 = vmatmul.msk.f32.gmra.mxu0 %vm410_vm8, %v384_v24  ;;  %1544 = vmatmul.msk.f32.gmra.mxu1 %vm410_vm8, %v384_v24 }
  0x66   : > { %1548 = vmatmul.msk.f32.gmra.mxu2 %vm410_vm8, %v384_v24  ;;  %1552 = vmatmul.msk.f32.gmra.mxu3 %vm410_vm8, %v384_v24 }
  0x6d   : > { %1541 = vmatmul.msk.f32.gmra.mxu0 %vm410_vm8, %v385_v25  ;;  %1545 = vmatmul.msk.f32.gmra.mxu1 %vm410_vm8, %v385_v25 }
  0x6e   : > { %1549 = vmatmul.msk.f32.gmra.mxu2 %vm410_vm8, %v385_v25  ;;  %1553 = vmatmul.msk.f32.gmra.mxu3 %vm410_vm8, %v385_v25 }
  0x87   : > { %v2069_v28 = vpop.permute.xlu1 %397 }
  0x88   : > { %v2071_v29 = vpop.permute.xlu0 %407 }
  0x8f   : > { %v2073_v34 = vpop.permute.xlu1 %392 }
  0x90   : > { %v2075_v35 = vpop.permute.xlu0 %402 }
  0xb2   : > { %v440_v26 = vpop.f32.mrf.mxu0  ;;  %v469_v27 = vpop.f32.mrf.mxu1 }
  0xb3   : > { %v2078_v36 = vadd.f32 %v440_v26, %v2073_v34  ;;  %v2081_v39 = vadd.f32 %v469_v27, %v2073_v34 }
  0xb5   : > { %v655_v45 = vmul.f32 0.5, %v2078_v36  ;;  %v656_v47 = vmul.f32 0.5, %v2081_v39 }
  0xb7   : > { %1645 = vtanh.f32 %v655_v45 }
  0xb8   : > { %1647 = vtanh.f32 %v656_v47 }
  0xb9   : > { %v498_v30 = vpop.f32.mrf.mxu2  ;;  %v527_v31 = vpop.f32.mrf.mxu3 }
  0xba   : > { %v443_v32 = vpop.f32.mrf.mxu0  ;;  %v472_v33 = vpop.f32.mrf.mxu1  ;;  %v2084_v40 = vadd.f32 %v498_v30, %v2073_v34  ;;  %v2087_v43 = vadd.f32 %v527_v31, %v2073_v34 }
  0xbb   : > { %v2099_v49 = vadd.f32 %v443_v32, %v2069_v28  ;;  %v2102_v50 = vadd.f32 %v472_v33, %v2069_v28 }
  0xbc   : > { %v657_v48 = vmul.f32 0.5, %v2084_v40  ;;  %v658_v51 = vmul.f32 0.5, %v2087_v43 }
  0xbd   : > { %v663_v56 = vmul.f32 0.5, %v2099_v49  ;;  %v664_v57 = vmul.f32 0.5, %v2102_v50  ;;  %v1646_v4 = vpop.eup %1645 }
  0xbe   : > { %1649 = vtanh.f32 %v657_v48  ;;  %v1648_v6 = vpop.eup %1647  ;;  %v719_v27 = vadd.f32 1.0, %v1646_v4 }
  0xbf   : > { %1651 = vtanh.f32 %v658_v51  ;;  %v720_v51 = vadd.f32 1.0, %v1648_v6 }
  0xc1   : > { %v501_v37 = vpop.f32.mrf.mxu2  ;;  %v530_v38 = vpop.f32.mrf.mxu3 }
  0xc2   : > { %v446_v41 = vpop.f32.mrf.mxu0  ;;  %v475_v42 = vpop.f32.mrf.mxu1  ;;  %v2120_v0 = vadd.f32 %v501_v37, %v2069_v28  ;;  %v2123_v1 = vadd.f32 %v530_v38, %v2069_v28 }
  0xc3   : > { %v2090_v44 = vadd.f32 %v446_v41, %v2075_v35  ;;  %v2094_v46 = vadd.f32 %v475_v42, %v2075_v35 }
  0xc4   : > { %v2128_v10 = vpop.eup %1649  ;;  %v665_v7 = vmul.f32 0.5, %v2120_v0  ;;  %v666_v12 = vmul.f32 0.5, %v2123_v1 }
  0xc5   : > { %v671_v52 = vmul.f32 0.5, %v2090_v44  ;;  %v672_v55 = vmul.f32 0.5, %v2094_v46  ;;  %v1652_v11 = vpop.eup %1651 }
  0xc7   : > { %1653 = vtanh.f32 %v671_v52 }
  0xc8   : > { %1655 = vtanh.f32 %v672_v55 }
  0xc9   : > { %v504_v53 = vpop.f32.mrf.mxu2  ;;  %v533_v54 = vpop.f32.mrf.mxu3  ;;  %1657 = vtanh.f32 %v663_v56 }
  0xca   : > { %v2110_v58 = vadd.f32 %v504_v53, %v2075_v35  ;;  %v449_v59 = vpop.f32.mrf.mxu0  ;;  %v478_v60 = vpop.f32.mrf.mxu1  ;;  %v2113_v61 = vadd.f32 %v533_v54, %v2075_v35  ;;  %1659 = vtanh.f32 %v664_v57  ;;  %v751_v57 = vmul.f32 0.5, %v719_v27 }
  0xcb   : > { %v450_v62 = vadd.f32 %v449_v59, %v2071_v29  ;;  %v2117_v63 = vadd.f32 %v478_v60, %v2071_v29 }
  0xcc   : > { %v673_v5 = vmul.f32 0.5, %v2110_v58  ;;  %v674_v9 = vmul.f32 0.5, %v2113_v61 }
  0xcd   : > { %v679_v2 = vmul.f32 0.5, %v450_v62  ;;  %v680_v3 = vmul.f32 0.5, %v2117_v63  ;;  %v1654_v15 = vpop.eup %1653 }
  0xce   : > { %v1656_v8 = vpop.eup %1655  ;;  %v735_v24 = vadd.f32 1.0, %v1654_v15  ;;  %v752_v15 = vmul.f32 0.5, %v720_v51 }
  0xcf   : > { %1661 = vtanh.f32 %v679_v2  ;;  %v1658_v20 = vpop.eup %1657  ;;  %v736_v26 = vadd.f32 1.0, %v1656_v8 }
  0xd0   : > { %1663 = vtanh.f32 %v680_v3  ;;  %v1660_v23 = vpop.eup %1659  ;;  %v727_v31 = vadd.f32 1.0, %v1658_v20  ;;  %v767_v48 = vmul.f32 0.5, %v735_v24 }
  0xd1   : > { %v507_v13 = vpop.f32.mrf.mxu2  ;;  %v536_v14 = vpop.f32.mrf.mxu3  ;;  %1665 = vtanh.f32 %v673_v5  ;;  %v728_v37 = vadd.f32 1.0, %v1660_v23  ;;  %v768_v56 = vmul.f32 0.5, %v736_v26  ;;  %v722_v23 = vadd.f32 1.0, %v1652_v11 }
  0xd2   : > { %v2133_v16 = vadd.f32 %v507_v13, %v2071_v29  ;;  %v2136_v17 = vadd.f32 %v536_v14, %v2071_v29  ;;  %v2138_v18 = vpop.f32.mrf.mxu0  ;;  %v2140_v19 = vpop.f32.mrf.mxu1  ;;  %1667 = vtanh.f32 %v674_v9  ;;  %v759_v60 = vmul.f32 0.5, %v727_v31 }
  0xd3   : > { %1669 = vtanh.f32 %v665_v7  ;;  %v760_v4 = vmul.f32 0.5, %v728_v37  ;;  %v799_v14 = vmul.f32 %v767_v48, %v2090_v44 }
  0xd4   : > { %v681_v21 = vmul.f32 0.5, %v2133_v16  ;;  %v682_v22 = vmul.f32 0.5, %v2136_v17  ;;  %1671 = vtanh.f32 %v666_v12  ;;  %v791_v24 = vmul.f32 %v759_v60, %v2099_v49 }
  0xd5   : > { %v1662_v25 = vpop.eup %1661  ;;  %v784_v49 = vmul.f32 %v752_v15, %v2081_v39  ;;  %v754_v39 = vmul.f32 0.5, %v722_v23 }
  0xd6   : > { %1673 = vtanh.f32 %v681_v21  ;;  %v1664_v30 = vpop.eup %1663  ;;  %v743_v32 = vadd.f32 1.0, %v1662_v25  ;;  %v800_v21 = vmul.f32 %v768_v56, %v2094_v46  ;;  %v792_v25 = vmul.f32 %v760_v4, %v2102_v50 }
  0xd7   : > { %1675 = vtanh.f32 %v682_v22  ;;  %v1666_v33 = vpop.eup %1665  ;;  %v744_v38 = vadd.f32 1.0, %v1664_v30  ;;  %v721_v22 = vadd.f32 1.0, %v2128_v10  ;;  %v2160_v46 = vadd.f32 %v2138_v18, %v2073_v34 }
  0xd8   : > { %v1668_v41 = vpop.eup %1667  ;;  %v775_v42 = vmul.f32 0.5, %v743_v32  ;;  %v737_v5 = vadd.f32 1.0, %v1666_v33  ;;  %v2166_v50 = vadd.f32 %v2140_v19, %v2073_v34  ;;  %v786_v56 = vmul.f32 %v754_v39, %v2087_v43 }
  0xd9   : > { %v614_v45 = vpop.f32.mrf.mxu2  ;;  %v2144_v47 = vpop.f32.mrf.mxu3  ;;  %v776_v53 = vmul.f32 0.5, %v744_v38  ;;  %v738_v9 = vadd.f32 1.0, %v1668_v41  ;;  %v753_v18 = vmul.f32 0.5, %v721_v22  ;;  %v659_v48 = vmul.f32 0.5, %v2160_v46 }
  0xda   : > { %v1670_v52 = vpop.eup %1669  ;;  %v2146_v54 = vpop.f32.mrf.mxu0  ;;  %v807_v2 = vmul.f32 %v775_v42, %v450_v62  ;;  %v783_v62 = vmul.f32 %v751_v57, %v2078_v36  ;;  %v769_v26 = vmul.f32 0.5, %v737_v5  ;;  %v2174_v38 = vadd.f32 %v614_v45, %v2073_v34 }
  0xdb   : > { %v2148_v55 = vpop.f32.mrf.mxu1  ;;  %v1672_v59 = vpop.eup %1671  ;;  %v808_v7 = vmul.f32 %v776_v53, %v2117_v63  ;;  %v729_v13 = vadd.f32 1.0, %v1670_v52  ;;  %v770_v27 = vmul.f32 0.5, %v738_v9  ;;  %v2194_v45 = vadd.f32 %v2146_v54, %v2069_v28 }
  0xdc   : > { %v1674_v3 = vpop.eup %1673  ;;  %868 = vmatpush.msra.mxu0 %v807_v2  ;;  %v730_v8 = vadd.f32 1.0, %v1672_v59  ;;  %v661_v52 = vmul.f32 0.5, %v2174_v38  ;;  %v785_v53 = vmul.f32 %v753_v18, %v2084_v40  ;;  %1677 = vtanh.f32 %v659_v48 }
  0xdd   : > { %v1676_v12 = vpop.eup %1675  ;;  %v745_v6 = vadd.f32 1.0, %v1674_v3  ;;  %897 = vmatpush.msra.mxu1 %v808_v7  ;;  %v761_v30 = vmul.f32 0.5, %v729_v13  ;;  %v802_v19 = vmul.f32 %v770_v27, %v2113_v61  ;;  %v660_v61 = vmul.f32 0.5, %v2166_v50  ;;  %v2213_v3 = vld [vmem:[%s2571_s3 + $0x8] sm:$0xff] }
  0xde   : > { %v746_v20 = vadd.f32 1.0, %v1676_v12  ;;  %869 = vmatpush.msra.mxu0 %v799_v14  ;;  %v762_v11 = vmul.f32 0.5, %v730_v8  ;;  %v2244_v8 = vadd.f32 %v2144_v47, %v2073_v34  ;;  %v2259_v34 = vld [vmem:[%s2571_s3 + $0x10] sm:$0xff] }
  0xdf   : > { %v777_v63 = vmul.f32 0.5, %v745_v6  ;;  %898 = vmatpush.msra.mxu1 %v800_v21  ;;  %v793_v42 = vmul.f32 %v761_v30, %v2120_v0  ;;  %v2198_v0 = vadd.f32 %v2148_v55, %v2069_v28  ;;  %1679 = vtanh.f32 %v660_v61 }
  0xe0   : > { %v778_v44 = vmul.f32 0.5, %v746_v20  ;;  %870 = vmatpush.msra.mxu0 %v791_v24  ;;  %v667_v55 = vmul.f32 0.5, %v2194_v45  ;;  %1681 = vtanh.f32 %v661_v52  ;;  %v662_v27 = vmul.f32 0.5, %v2244_v8 }
  0xe1   : > { %v809_v31 = vmul.f32 %v777_v63, %v2133_v16  ;;  %v617_v36 = vpop.f32.mrf.mxu2  ;;  %v646_v10 = vpop.f32.mrf.mxu3  ;;  %899 = vmatpush.msra.mxu1 %v792_v25  ;;  %v2171_v16 = vld [vmem:[%s2571_s3] sm:$0xff]  ;;  %v668_v60 = vmul.f32 0.5, %v2198_v0 }
  0xe2   : > { %v810_v32 = vmul.f32 %v778_v44, %v2136_v17  ;;  %v562_v33 = vpop.f32.mrf.mxu0  ;;  %871 = vmatpush.msra.mxu0 %v783_v62  ;;  %v801_v17 = vmul.f32 %v769_v26, %v2110_v58  ;;  %v794_v58 = vmul.f32 %v762_v11, %v2123_v1  ;;  %v2208_v2 = vadd.f32 %v617_v36, %v2069_v28  ;;  %v1678_v15 = vpop.eup %1677 }
  0xe3   : > { %v591_v37 = vpop.f32.mrf.mxu1  ;;  %926 = vmatpush.msra.mxu2 %v809_v31  ;;  %v2179_v41 = vadd.f32 %v562_v33, %v2075_v35  ;;  %900 = vmatpush.msra.mxu1 %v784_v49  ;;  %v2232_v12 = vadd.f32 %v646_v10, %v2069_v28  ;;  %v822_v31 = vld [vmem:[%s2572_s4 + $0x18] sm:$0xff] }
  0xe4   : > { %955 = vmatpush.msra.mxu3 %v810_v32  ;;  %v2184_v51 = vadd.f32 %v591_v37, %v2075_v35  ;;  %1554 = vmatmul.msk.f32.vlgmr.msra.gmra.mxu0 %vm843_vm9, %v2171_v16  ;;  %v669_v14 = vmul.f32 0.5, %v2208_v2 }
  0xe5   : > { %1558 = vmatmul.msk.f32.vlgmr.msra.gmra.mxu1 %vm843_vm9, %v2171_v16  ;;  %927 = vmatpush.msra.mxu2 %v801_v17  ;;  %v675_v1 = vmul.f32 0.5, %v2179_v41  ;;  %v1680_v28 = vpop.eup %1679  ;;  %v670_v62 = vmul.f32 0.5, %v2232_v12 }
  0xe6   : > { %956 = vmatpush.msra.mxu3 %v802_v19  ;;  %v676_v54 = vmul.f32 0.5, %v2184_v51  ;;  %v2247_v21 = vpop.eup %1681  ;;  %840 = vperm.xlu2 %1642, %v822_v31   ;;  %v723_v19 = vadd.f32 1.0, %v1678_v15 }
  0xe7   : > { %928 = vmatpush.msra.mxu2 %v793_v42  ;;  %1683 = vtanh.f32 %v675_v1 }
  0xe8   : > { %957 = vmatpush.msra.mxu3 %v794_v58  ;;  %1685 = vtanh.f32 %v676_v54  ;;  %v724_v58 = vadd.f32 1.0, %v1680_v28 }
  0xe9   : > { %v620_v57 = vpop.f32.mrf.mxu2  ;;  %v649_v59 = vpop.f32.mrf.mxu3  ;;  %929 = vmatpush.msra.mxu2 %v785_v53  ;;  %1687 = vtanh.f32 %v667_v55 }
  0xea   : > { %958 = vmatpush.msra.mxu3 %v786_v56  ;;  %v565_v40 = vpop.f32.mrf.mxu0  ;;  %v2216_v4 = vadd.f32 %v620_v57, %v2075_v35  ;;  %1562 = vmatmul.msk.f32.vlgmr.msra.gmra.mxu2 %vm843_vm9, %v2171_v16  ;;  %v2229_v7 = vadd.f32 %v649_v59, %v2075_v35  ;;  %1689 = vtanh.f32 %v668_v60  ;;  %v2278_v56 = vld [vmem:[%s2571_s3 + $0x18] sm:$0xff] }
  0xeb   : > { %v594_v43 = vpop.f32.mrf.mxu1  ;;  %1566 = vmatmul.msk.f32.vlgmr.msra.gmra.mxu3 %vm843_vm9, %v2171_v16  ;;  %v2223_v5 = vadd.f32 %v565_v40, %v2071_v29 }
  0xec   : > { %v2226_v9 = vadd.f32 %v594_v43, %v2071_v29  ;;  %1555 = vmatmul.msk.f32.gmra.mxu0 %vm843_vm9, %v2213_v3  ;;  %v677_v35 = vmul.f32 0.5, %v2216_v4  ;;  %v678_v20 = vmul.f32 0.5, %v2229_v7  ;;  %v755_v43 = vmul.f32 0.5, %v723_v19 }
  0xed   : > { %v683_v13 = vmul.f32 0.5, %v2223_v5  ;;  %1559 = vmatmul.msk.f32.gmra.mxu1 %vm843_vm9, %v2213_v3  ;;  %v1684_v24 = vpop.eup %1683 }
  0xee   : > { %v684_v6 = vmul.f32 0.5, %v2226_v9  ;;  %v1686_v47 = vpop.eup %1685  ;;  %v739_v10 = vadd.f32 1.0, %v1684_v24  ;;  %v725_v24 = vadd.f32 1.0, %v2247_v21 }
  0xef   : > { %1691 = vtanh.f32 %v683_v13  ;;  %v1688_v26 = vpop.eup %1687  ;;  %v740_v49 = vadd.f32 1.0, %v1686_v47 }
  0xf0   : > { %1693 = vtanh.f32 %v684_v6  ;;  %v1690_v30 = vpop.eup %1689  ;;  %v731_v37 = vadd.f32 1.0, %v1688_v26  ;;  %v771_v61 = vmul.f32 0.5, %v739_v10 }
  0xf1   : > { %v623_v22 = vpop.f32.mrf.mxu2  ;;  %v652_v23 = vpop.f32.mrf.mxu3  ;;  %1695 = vtanh.f32 %v669_v14  ;;  %v732_v18 = vadd.f32 1.0, %v1690_v30  ;;  %v772_v52 = vmul.f32 0.5, %v740_v49  ;;  %v787_v30 = vmul.f32 %v755_v43, %v2160_v46 }
  0xf2   : > { %v2251_v63 = vadd.f32 %v623_v22, %v2071_v29  ;;  %v2254_v25 = vadd.f32 %v652_v23, %v2071_v29  ;;  %1697 = vtanh.f32 %v677_v35  ;;  %1563 = vmatmul.msk.f32.gmra.mxu2 %vm843_vm9, %v2213_v3  ;;  %v763_v59 = vmul.f32 0.5, %v731_v37 }
  0xf3   : > { %1567 = vmatmul.msk.f32.gmra.mxu3 %vm843_vm9, %v2213_v3  ;;  %1699 = vtanh.f32 %v678_v20  ;;  %v764_v55 = vmul.f32 0.5, %v732_v18  ;;  %v756_v35 = vmul.f32 0.5, %v724_v58  ;;  %v803_v28 = vmul.f32 %v771_v61, %v2179_v41 }
  0xf4   : > { %v685_v29 = vmul.f32 0.5, %v2251_v63  ;;  %v686_v44 = vmul.f32 0.5, %v2254_v25  ;;  %1701 = vtanh.f32 %v670_v62  ;;  %1556 = vmatmul.msk.f32.gmra.mxu0 %vm843_vm9, %v2259_v34  ;;  %v795_v47 = vmul.f32 %v763_v59, %v2194_v45 }
  0xf5   : > { %1560 = vmatmul.msk.f32.gmra.mxu1 %vm843_vm9, %v2259_v34  ;;  %v1692_v36 = vpop.eup %1691  ;;  %v796_v26 = vmul.f32 %v764_v55, %v2198_v0  ;;  %v788_v31 = vmul.f32 %v756_v35, %v2166_v50  ;;  %v757_v0 = vmul.f32 0.5, %v725_v24 }
  0xf6   : > { %1703 = vtanh.f32 %v685_v29  ;;  %v1694_v11 = vpop.eup %1693  ;;  %v747_v32 = vadd.f32 1.0, %v1692_v36 }
  0xf7   : > { %1705 = vtanh.f32 %v686_v44  ;;  %v1696_v33 = vpop.eup %1695  ;;  %v748_v39 = vadd.f32 1.0, %v1694_v11  ;;  %v2349_v11 = vpop.permute.xlu1 %825 }
  0xf8   : > { %1707 = vtanh.f32 %v662_v27  ;;  %v1698_v17 = vpop.eup %1697  ;;  %v779_v42 = vmul.f32 0.5, %v747_v32  ;;  %v733_v62 = vadd.f32 1.0, %v1696_v33  ;;  %v2351_v32 = vpop.permute.xlu0 %830 }
  0xf9   : > { %v1700_v48 = vpop.eup %1699  ;;  %v780_v53 = vmul.f32 0.5, %v748_v39  ;;  %v741_v13 = vadd.f32 1.0, %v1698_v17 }
  0xfa   : > { %v1702_v1 = vpop.eup %1701  ;;  %v811_v54 = vmul.f32 %v779_v42, %v2223_v5  ;;  %1564 = vmatmul.msk.f32.gmra.mxu2 %vm843_vm9, %v2259_v34  ;;  %v742_v6 = vadd.f32 1.0, %v1700_v48  ;;  %v821_v5 = vld [vmem:[%s2572_s4 + $0x10] sm:$0xff]  ;;  %v765_v21 = vmul.f32 0.5, %v733_v62 }
  0xfb   : > { %1568 = vmatmul.msk.f32.gmra.mxu3 %vm843_vm9, %v2259_v34  ;;  %v812_v60 = vmul.f32 %v780_v53, %v2226_v9  ;;  %v804_v9 = vmul.f32 %v772_v52, %v2184_v51  ;;  %v734_v22 = vadd.f32 1.0, %v1702_v1  ;;  %835 = vperm.xlu2 %1642, %v821_v5   ;;  %v773_v41 = vmul.f32 0.5, %v741_v13 }
  0xfc   : > { %v1704_v57 = vpop.eup %1703  ;;  %1557 = vmatmul.msk.f32.gmra.mxu0 %vm843_vm9, %v2278_v56  ;;  %v774_v44 = vmul.f32 0.5, %v742_v6  ;;  %v797_v10 = vmul.f32 %v765_v21, %v2208_v2 }
  0xfd   : > { %v1706_v40 = vpop.eup %1705  ;;  %v749_v14 = vadd.f32 1.0, %v1704_v57  ;;  %1561 = vmatmul.msk.f32.gmra.mxu1 %vm843_vm9, %v2278_v56  ;;  %984 = vmatpush.msrb.mxu0 %v811_v54  ;;  %v766_v45 = vmul.f32 0.5, %v734_v22  ;;  %v805_v46 = vmul.f32 %v773_v41, %v2216_v4  ;;  %v789_v4 = vmul.f32 %v757_v0, %v2174_v38 }
  0xfe   : > { %v1708_v15 = vpop.eup %1707  ;;  %v750_v20 = vadd.f32 1.0, %v1706_v40  ;;  %1013 = vmatpush.msrb.mxu1 %v812_v60  ;;  %v806_v50 = vmul.f32 %v774_v44, %v2229_v7 }
  0xff   : > { %v781_v23 = vmul.f32 0.5, %v749_v14  ;;  %985 = vmatpush.msrb.mxu0 %v803_v28  ;;  %v726_v29 = vadd.f32 1.0, %v1708_v15  ;;  %v798_v49 = vmul.f32 %v766_v45, %v2232_v12 }
 0x100   : > { %v782_v27 = vmul.f32 0.5, %v750_v20  ;;  %1014 = vmatpush.msrb.mxu1 %v804_v9 }
 0x101   : > { %v813_v51 = vmul.f32 %v781_v23, %v2251_v63  ;;  %986 = vmatpush.msrb.mxu0 %v795_v47  ;;  %v758_v63 = vmul.f32 0.5, %v726_v29 }
 0x102   : > { %v814_v36 = vmul.f32 %v782_v27, %v2254_v25  ;;  %1015 = vmatpush.msrb.mxu1 %v796_v26  ;;  %1565 = vmatmul.msk.f32.gmra.mxu2 %vm843_vm9, %v2278_v56  ;;  %v1249_v25 = vld [vmem:[%s2574_s6] sm:$0xf] }
 0x103   : > { %1569 = vmatmul.msk.f32.gmra.mxu3 %vm843_vm9, %v2278_v56  ;;  %987 = vmatpush.msrb.mxu0 %v787_v30  ;;  %v790_v7 = vmul.f32 %v758_v63, %v2244_v8 }
 0x104   : > { %1016 = vmatpush.msrb.mxu1 %v788_v31  ;;  %1042 = vmatpush.msrb.mxu2 %v813_v51 }
 0x105   : > { %1071 = vmatpush.msrb.mxu3 %v814_v36  ;;  %1570 = vmatmul.msk.f32.vlgmr.msrb.gmra.mxu0 %vm843_vm9, %v2171_v16 }
 0x106   : > { %1574 = vmatmul.msk.f32.vlgmr.msrb.gmra.mxu1 %vm843_vm9, %v2171_v16  ;;  %1043 = vmatpush.msrb.mxu2 %v805_v46 }
 0x107   : > { %1072 = vmatpush.msrb.mxu3 %v806_v50  ;;  %1252 = vperm.xlu2 %1642, %v1249_v25  }
 0x108   : > { %1044 = vmatpush.msrb.mxu2 %v797_v10 }
 0x109   : > { %1073 = vmatpush.msrb.mxu3 %v798_v49 }
 0x10a   : > { %1045 = vmatpush.msrb.mxu2 %v789_v4 }
 0x10b   : > { %1074 = vmatpush.msrb.mxu3 %v790_v7  ;;  %1578 = vmatmul.msk.f32.vlgmr.msrb.gmra.mxu2 %vm843_vm9, %v2171_v16 }
 0x10c   : > { %1582 = vmatmul.msk.f32.vlgmr.msrb.gmra.mxu3 %vm843_vm9, %v2171_v16 }
 0x10d   : > { %1571 = vmatmul.msk.f32.gmra.mxu0 %vm843_vm9, %v2213_v3 }
 0x10e   : > { %1575 = vmatmul.msk.f32.gmra.mxu1 %vm843_vm9, %v2213_v3 }
 0x113   : > { %1579 = vmatmul.msk.f32.gmra.mxu2 %vm843_vm9, %v2213_v3 }
 0x114   : > { %1583 = vmatmul.msk.f32.gmra.mxu3 %vm843_vm9, %v2213_v3 }
 0x115   : > { %1572 = vmatmul.msk.f32.gmra.mxu0 %vm843_vm9, %v2259_v34 }
 0x116   : > { %1576 = vmatmul.msk.f32.gmra.mxu1 %vm843_vm9, %v2259_v34 }
 0x11b   : > { %1580 = vmatmul.msk.f32.gmra.mxu2 %vm843_vm9, %v2259_v34 }
 0x11c   : > { %1584 = vmatmul.msk.f32.gmra.mxu3 %vm843_vm9, %v2259_v34 }
 0x11d   : > { %1573 = vmatmul.msk.f32.gmra.mxu0 %vm843_vm9, %v2278_v56 }
 0x11e   : > { %1577 = vmatmul.msk.f32.gmra.mxu1 %vm843_vm9, %v2278_v56 }
 0x123   : > { %1581 = vmatmul.msk.f32.gmra.mxu2 %vm843_vm9, %v2278_v56 }
 0x124   : > { %1585 = vmatmul.msk.f32.gmra.mxu3 %vm843_vm9, %v2278_v56 }
 0x140   : > { %v2347_v2 = vpop.permute.xlu2 %840 }
 0x155   : > { %v2356_v37 = vpop.permute.xlu2 %835 }
 0x161   : > { %v873_v16 = vpop.f32.mrf.mxu0 }
 0x162   : > { %v902_v38 = vpop.f32.mrf.mxu1  ;;  %v2354_v33 = vadd.f32 %v873_v16, %v2349_v11 }
 0x163   : > { %v2372_v61 = vadd.f32 %v902_v38, %v2349_v11 }
 0x164   : > { %v1088_v48 = vmul.f32 0.5, %v2354_v33 }
 0x165   : > { %v1089_v59 = vmul.f32 0.5, %v2372_v61 }
 0x166   : > { %1709 = vtanh.f32 %v1088_v48 }
 0x169   : > { %v876_v3 = vpop.f32.mrf.mxu0 }
 0x16a   : > { %v905_v12 = vpop.f32.mrf.mxu1  ;;  %v2359_v18 = vadd.f32 %v876_v3, %v2351_v32 }
 0x16b   : > { %v2369_v58 = vadd.f32 %v905_v12, %v2351_v32 }
 0x16c   : > { %v1096_v52 = vmul.f32 0.5, %v2359_v18  ;;  %v1710_v9 = vpop.eup %1709 }
 0x16d   : > { %v931_v8 = vpop.f32.mrf.mxu2  ;;  %v1097_v57 = vmul.f32 0.5, %v2369_v58  ;;  %v1152_v0 = vadd.f32 1.0, %v1710_v9 }
 0x16e   : > { %v960_v34 = vpop.f32.mrf.mxu3  ;;  %1711 = vtanh.f32 %v1096_v52  ;;  %v2381_v43 = vadd.f32 %v931_v8, %v2349_v11 }
 0x16f   : > { %v2385_v6 = vadd.f32 %v960_v34, %v2349_v11 }
 0x170   : > { %v1090_v22 = vmul.f32 0.5, %v2381_v43 }
 0x171   : > { %v879_v39 = vpop.f32.mrf.mxu0  ;;  %v1091_v47 = vmul.f32 0.5, %v2385_v6 }
 0x172   : > { %v908_v17 = vpop.f32.mrf.mxu1  ;;  %v2362_v19 = vadd.f32 %v879_v39, %v2356_v37 }
 0x173   : > { %v2365_v42 = vadd.f32 %v908_v17, %v2356_v37 }
 0x174   : > { %v1104_v1 = vmul.f32 0.5, %v2362_v19  ;;  %v1712_v62 = vpop.eup %1711 }
 0x175   : > { %v934_v53 = vpop.f32.mrf.mxu2  ;;  %v1105_v54 = vmul.f32 0.5, %v2365_v42  ;;  %v1160_v63 = vadd.f32 1.0, %v1712_v62 }
 0x176   : > { %v963_v56 = vpop.f32.mrf.mxu3  ;;  %1713 = vtanh.f32 %v1104_v1  ;;  %v2388_v5 = vadd.f32 %v934_v53, %v2351_v32 }
 0x177   : > { %1715 = vtanh.f32 %v1105_v54  ;;  %v2400_v29 = vadd.f32 %v963_v56, %v2351_v32  ;;  %v1192_v56 = vmul.f32 0.5, %v1160_v63 }
 0x178   : > { %1717 = vtanh.f32 %v1097_v57  ;;  %v1098_v27 = vmul.f32 0.5, %v2388_v5 }
 0x179   : > { %v882_v55 = vpop.f32.mrf.mxu0  ;;  %1719 = vtanh.f32 %v1089_v59  ;;  %v1099_v10 = vmul.f32 0.5, %v2400_v29 }
 0x17a   : > { %v911_v60 = vpop.f32.mrf.mxu1  ;;  %v883_v40 = vadd.f32 %v882_v55, %v2347_v2 }
 0x17b   : > { %v912_v13 = vadd.f32 %v911_v60, %v2347_v2 }
 0x17c   : > { %v1112_v14 = vmul.f32 0.5, %v883_v40  ;;  %v1714_v24 = vpop.eup %1713 }
 0x17d   : > { %v1113_v15 = vmul.f32 0.5, %v912_v13  ;;  %v937_v35 = vpop.f32.mrf.mxu2  ;;  %v1716_v26 = vpop.eup %1715  ;;  %v1168_v21 = vadd.f32 1.0, %v1714_v24 }
 0x17e   : > { %v966_v28 = vpop.f32.mrf.mxu3  ;;  %1721 = vtanh.f32 %v1112_v14  ;;  %v2391_v20 = vadd.f32 %v937_v35, %v2356_v37  ;;  %v1718_v41 = vpop.eup %1717  ;;  %v1169_v46 = vadd.f32 1.0, %v1716_v26 }
 0x17f   : > { %1723 = vtanh.f32 %v1113_v15  ;;  %v2395_v23 = vadd.f32 %v966_v28, %v2356_v37  ;;  %v1720_v31 = vpop.eup %1719  ;;  %v1161_v25 = vadd.f32 1.0, %v1718_v41  ;;  %v1200_v34 = vmul.f32 0.5, %v1168_v21 }
 0x180   : > { %v1106_v44 = vmul.f32 0.5, %v2391_v20  ;;  %1725 = vtanh.f32 %v1090_v22  ;;  %v1153_v12 = vadd.f32 1.0, %v1720_v31  ;;  %v1201_v52 = vmul.f32 0.5, %v1169_v46 }
 0x181   : > { %v1107_v36 = vmul.f32 0.5, %v2395_v23  ;;  %1727 = vtanh.f32 %v1091_v47  ;;  %v1193_v57 = vmul.f32 0.5, %v1161_v25  ;;  %v1184_v15 = vmul.f32 0.5, %v1152_v0 }
 0x182   : > { %v2403_v51 = vpop.f32.mrf.mxu0  ;;  %1729 = vtanh.f32 %v1098_v27  ;;  %v1232_v35 = vmul.f32 %v1200_v34, %v2362_v19  ;;  %v1185_v9 = vmul.f32 0.5, %v1153_v12  ;;  %v1233_v62 = vmul.f32 %v1201_v52, %v2365_v42  ;;  %v2429_v42 = vld [vmem:[%s2573_s5] sm:$0xf] }
 0x183   : > { %v2405_v30 = vpop.f32.mrf.mxu1  ;;  %1731 = vtanh.f32 %v1106_v44  ;;  %v1216_v27 = vmul.f32 %v1184_v15, %v2354_v33 }
 0x184   : > { %v1722_v45 = vpop.eup %1721  ;;  %1733 = vtanh.f32 %v1107_v36  ;;  %v2434_v36 = vadd.f32 %v2403_v51, %v2349_v11 }
 0x185   : > { %v1724_v50 = vpop.eup %1723  ;;  %v1176_v49 = vadd.f32 1.0, %v1722_v45  ;;  %v940_v4 = vpop.f32.mrf.mxu2  ;;  %1735 = vtanh.f32 %v1099_v10 }
 0x186   : > { %v969_v7 = vpop.f32.mrf.mxu3  ;;  %v1177_v16 = vadd.f32 1.0, %v1724_v50  ;;  %v2410_v38 = vadd.f32 %v940_v4, %v2347_v2  ;;  %v1726_v53 = vpop.eup %1725  ;;  %v1092_v12 = vmul.f32 0.5, %v2434_v36 }
 0x187   : > { %v2413_v3 = vadd.f32 %v969_v7, %v2347_v2  ;;  %v1208_v8 = vmul.f32 0.5, %v1176_v49  ;;  %v1728_v54 = vpop.eup %1727 }
 0x188   : > { %v1209_v39 = vmul.f32 0.5, %v1177_v16  ;;  %v1114_v17 = vmul.f32 0.5, %v2410_v38  ;;  %v1730_v14 = vpop.eup %1729  ;;  %v1155_v51 = vadd.f32 1.0, %v1728_v54 }
 0x189   : > { %v1115_v48 = vmul.f32 0.5, %v2413_v3  ;;  %v1240_v1 = vmul.f32 %v1208_v8, %v883_v40  ;;  %v1732_v28 = vpop.eup %1731  ;;  %v1224_v40 = vmul.f32 %v1192_v56, %v2359_v18  ;;  %v1217_v18 = vmul.f32 %v1185_v9, %v2372_v61 }
 0x18a   : > { %v1241_v59 = vmul.f32 %v1209_v39, %v912_v13  ;;  %1737 = vtanh.f32 %v1114_v17  ;;  %v992_v55 = vpop.f32.mrf.mxu0  ;;  %v1734_v22 = vpop.eup %1733  ;;  %v1225_v13 = vmul.f32 %v1193_v57, %v2369_v58  ;;  %v1170_v19 = vadd.f32 1.0, %v1732_v28 }
 0x18b   : > { %v1021_v60 = vpop.f32.mrf.mxu1  ;;  %1739 = vtanh.f32 %v1115_v48  ;;  %1270 = vmatpush.msra.mxu0 %v1240_v1  ;;  %v1736_v26 = vpop.eup %1735  ;;  %v1171_v44 = vadd.f32 1.0, %v1734_v22  ;;  %v1162_v31 = vadd.f32 1.0, %v1730_v14  ;;  %v2437_v0 = vadd.f32 %v992_v55, %v2351_v32 }
 0x18c   : > { %1290 = vmatpush.msra.mxu1 %v1241_v59  ;;  %v1163_v33 = vadd.f32 1.0, %v1736_v26  ;;  %v1154_v61 = vadd.f32 1.0, %v1726_v53  ;;  %v1202_v50 = vmul.f32 0.5, %v1170_v19  ;;  %v2452_v34 = vadd.f32 %v1021_v60, %v2351_v32 }
 0x18d   : > { %1271 = vmatpush.msra.mxu0 %v1232_v35  ;;  %v1203_v49 = vmul.f32 0.5, %v1171_v44  ;;  %v1194_v16 = vmul.f32 0.5, %v1162_v31  ;;  %v2456_v17 = vadd.f32 %v2405_v30, %v2349_v11  ;;  %v1100_v52 = vmul.f32 0.5, %v2437_v0 }
 0x18e   : > { %v2421_v24 = vpop.f32.mrf.mxu2  ;;  %1291 = vmatpush.msra.mxu1 %v1233_v62  ;;  %v1195_v39 = vmul.f32 0.5, %v1163_v33  ;;  %v1186_v1 = vmul.f32 0.5, %v1154_v61  ;;  %v1234_v54 = vmul.f32 %v1202_v50, %v2391_v20  ;;  %1741 = vtanh.f32 %v1092_v12 }
 0x18f   : > { %v2423_v47 = vpop.f32.mrf.mxu3  ;;  %1272 = vmatpush.msra.mxu0 %v1224_v40  ;;  %v1235_v59 = vmul.f32 %v1203_v49, %v2395_v23  ;;  %v1226_v30 = vmul.f32 %v1194_v16, %v2388_v5  ;;  %v1093_v14 = vmul.f32 0.5, %v2456_v17  ;;  %1743 = vtanh.f32 %v1100_v52 }
 0x190   : > { %v1738_v41 = vpop.eup %1737  ;;  %1292 = vmatpush.msra.mxu1 %v1225_v13  ;;  %v1227_v60 = vmul.f32 %v1195_v39, %v2400_v29  ;;  %v1218_v35 = vmul.f32 %v1186_v1, %v2381_v43  ;;  %v2475_v28 = vadd.f32 %v2421_v24, %v2349_v11  ;;  %v2480_v9 = vadd.f32 %v2423_v47, %v2349_v11 }
 0x191   : > { %v1740_v58 = vpop.eup %1739  ;;  %v1178_v21 = vadd.f32 1.0, %v1738_v41  ;;  %1273 = vmatpush.msra.mxu0 %v1216_v27 }
 0x192   : > { %v1179_v45 = vadd.f32 1.0, %v1740_v58  ;;  %v995_v63 = vpop.f32.mrf.mxu0  ;;  %1293 = vmatpush.msra.mxu1 %v1217_v18  ;;  %1586 = vmatmul.msk.f32.vlgmr.msra.gmra.mxu0 %vm843_vm9, %v2429_v42  ;;  %v1094_v47 = vmul.f32 0.5, %v2475_v28  ;;  %v1095_v19 = vmul.f32 0.5, %v2480_v9 }
 0x193   : > { %v1024_v46 = vpop.f32.mrf.mxu1  ;;  %v1210_v25 = vmul.f32 0.5, %v1178_v21  ;;  %v2442_v10 = vadd.f32 %v995_v63, %v2356_v37  ;;  %1587 = vmatmul.msk.f32.vlgmr.msra.gmra.mxu1 %vm843_vm9, %v2429_v42 }
 0x194   : > { %v1211_v4 = vmul.f32 0.5, %v1179_v45  ;;  %v2447_v7 = vadd.f32 %v1024_v46, %v2356_v37  ;;  %v1742_v13 = vpop.eup %1741 }
 0x195   : > { %v1242_v8 = vmul.f32 %v1210_v25, %v2410_v38  ;;  %v1108_v57 = vmul.f32 0.5, %v2442_v10  ;;  %v1187_v38 = vmul.f32 0.5, %v1155_v51  ;;  %v1744_v11 = vpop.eup %1743 }
 0x196   : > { %v1243_v48 = vmul.f32 %v1211_v4, %v2413_v3  ;;  %v1050_v53 = vpop.f32.mrf.mxu2  ;;  %v1109_v55 = vmul.f32 0.5, %v2447_v7  ;;  %v1101_v3 = vmul.f32 0.5, %v2452_v34  ;;  %v1164_v46 = vadd.f32 1.0, %v1744_v11 }
 0x197   : > { %v1079_v56 = vpop.f32.mrf.mxu3  ;;  %1310 = vmatpush.msra.mxu2 %v1242_v8  ;;  %1745 = vtanh.f32 %v1108_v57  ;;  %v1219_v5 = vmul.f32 %v1187_v38, %v2385_v6  ;;  %v2484_v62 = vadd.f32 %v1050_v53, %v2351_v32 }
 0x198   : > { %1330 = vmatpush.msra.mxu3 %v1243_v48  ;;  %1747 = vtanh.f32 %v1109_v55  ;;  %v2500_v44 = vadd.f32 %v1079_v56, %v2351_v32  ;;  %v1196_v38 = vmul.f32 0.5, %v1164_v46 }
 0x199   : > { %1311 = vmatpush.msra.mxu2 %v1234_v54  ;;  %1749 = vtanh.f32 %v1101_v3  ;;  %v1102_v18 = vmul.f32 0.5, %v2484_v62 }
 0x19a   : > { %v998_v20 = vpop.f32.mrf.mxu0  ;;  %1331 = vmatpush.msra.mxu3 %v1235_v59  ;;  %1751 = vtanh.f32 %v1093_v14  ;;  %v1103_v51 = vmul.f32 0.5, %v2500_v44 }
 0x19b   : > { %v1027_v15 = vpop.f32.mrf.mxu1  ;;  %v2470_v23 = vadd.f32 %v998_v20, %v2347_v2  ;;  %1312 = vmatpush.msra.mxu2 %v1226_v30 }
 0x19c   : > { %v1028_v29 = vadd.f32 %v1027_v15, %v2347_v2  ;;  %1332 = vmatpush.msra.mxu3 %v1227_v60 }
 0x19d   : > { %v1116_v43 = vmul.f32 0.5, %v2470_v23  ;;  %1313 = vmatpush.msra.mxu2 %v1218_v35  ;;  %v1746_v27 = vpop.eup %1745 }
 0x19e   : > { %v1117_v6 = vmul.f32 0.5, %v1028_v29  ;;  %v1053_v22 = vpop.f32.mrf.mxu2  ;;  %1333 = vmatpush.msra.mxu3 %v1219_v5  ;;  %1588 = vmatmul.msk.f32.vlgmr.msra.gmra.mxu2 %vm843_vm9, %v2429_v42  ;;  %v1748_v41 = vpop.eup %1747  ;;  %v1172_v33 = vadd.f32 1.0, %v1746_v27 }
 0x19f   : > { %v1082_v40 = vpop.f32.mrf.mxu3  ;;  %1753 = vtanh.f32 %v1116_v43  ;;  %v2489_v24 = vadd.f32 %v1053_v22, %v2356_v37  ;;  %1589 = vmatmul.msk.f32.vlgmr.msra.gmra.mxu3 %vm843_vm9, %v2429_v42  ;;  %v1750_v58 = vpop.eup %1749  ;;  %v1173_v61 = vadd.f32 1.0, %v1748_v41  ;;  %v1228_v43 = vmul.f32 %v1196_v38, %v2437_v0 }
 0x1a0   : > { %1755 = vtanh.f32 %v1117_v6  ;;  %v2495_v26 = vadd.f32 %v1082_v40, %v2356_v37  ;;  %v1752_v21 = vpop.eup %1751  ;;  %v1156_v37 = vadd.f32 1.0, %v1742_v13  ;;  %v1165_v25 = vadd.f32 1.0, %v1750_v58 }
 0x1a1   : > { %v1110_v31 = vmul.f32 0.5, %v2489_v24  ;;  %1757 = vtanh.f32 %v1094_v47  ;;  %v1157_v39 = vadd.f32 1.0, %v1752_v21  ;;  %v1204_v48 = vmul.f32 0.5, %v1172_v33 }
 0x1a2   : > { %v1111_v45 = vmul.f32 0.5, %v2495_v26  ;;  %1759 = vtanh.f32 %v1095_v19  ;;  %v1205_v53 = vmul.f32 0.5, %v1173_v61  ;;  %v1197_v30 = vmul.f32 0.5, %v1165_v25 }
 0x1a3   : > { %1761 = vtanh.f32 %v1102_v18  ;;  %v1188_v14 = vmul.f32 0.5, %v1156_v37  ;;  %v1189_v15 = vmul.f32 0.5, %v1157_v39 }
 0x1a4   : > { %1763 = vtanh.f32 %v1110_v31  ;;  %v1237_v35 = vmul.f32 %v1205_v53, %v2447_v7 }
 0x1a5   : > { %v1754_v63 = vpop.eup %1753  ;;  %1765 = vtanh.f32 %v1111_v45  ;;  %v1220_v6 = vmul.f32 %v1188_v14, %v2434_v36  ;;  %v1221_v40 = vmul.f32 %v1189_v15, %v2456_v17 }
 0x1a6   : > { %v1756_v50 = vpop.eup %1755  ;;  %v1180_v32 = vadd.f32 1.0, %v1754_v63  ;;  %v1056_v49 = vpop.f32.mrf.mxu2  ;;  %1767 = vtanh.f32 %v1103_v51 }
 0x1a7   : > { %v1085_v4 = vpop.f32.mrf.mxu3  ;;  %v1181_v16 = vadd.f32 1.0, %v1756_v50  ;;  %v1057_v12 = vadd.f32 %v1056_v49, %v2347_v2  ;;  %v1758_v57 = vpop.eup %1757 }
 0x1a8   : > { %v1086_v8 = vadd.f32 %v1085_v4, %v2347_v2  ;;  %v1212_v52 = vmul.f32 0.5, %v1180_v32  ;;  %v1760_v55 = vpop.eup %1759  ;;  %v1236_v2 = vmul.f32 %v1204_v48, %v2442_v10 }
 0x1a9   : > { %v1213_v56 = vmul.f32 0.5, %v1181_v16  ;;  %v1118_v1 = vmul.f32 0.5, %v1057_v12  ;;  %v1762_v60 = vpop.eup %1761  ;;  %v1159_v41 = vadd.f32 1.0, %v1760_v55 }
 0x1aa   : > { %v1119_v54 = vmul.f32 0.5, %v1086_v8  ;;  %v1244_v59 = vmul.f32 %v1212_v52, %v2470_v23  ;;  %v1764_v20 = vpop.eup %1763  ;;  %v1229_v23 = vmul.f32 %v1197_v30, %v2452_v34  ;;  %v1166_v7 = vadd.f32 1.0, %v1762_v60 }
 0x1ab   : > { %v1245_v3 = vmul.f32 %v1213_v56, %v1028_v29  ;;  %1769 = vtanh.f32 %v1118_v1  ;;  %v1766_v5 = vpop.eup %1765  ;;  %v1174_v22 = vadd.f32 1.0, %v1764_v20  ;;  %v1158_v34 = vadd.f32 1.0, %v1758_v57 }
 0x1ac   : > { %1771 = vtanh.f32 %v1119_v54  ;;  %1350 = vmatpush.msrb.mxu0 %v1244_v59  ;;  %v1768_v29 = vpop.eup %1767  ;;  %v1175_v13 = vadd.f32 1.0, %v1766_v5  ;;  %v1198_v58 = vmul.f32 0.5, %v1166_v7  ;;  %v1191_v37 = vmul.f32 0.5, %v1159_v41 }
 0x1ad   : > { %1370 = vmatpush.msrb.mxu1 %v1245_v3  ;;  %v1167_v27 = vadd.f32 1.0, %v1768_v29  ;;  %v1206_v19 = vmul.f32 0.5, %v1174_v22  ;;  %v1190_v45 = vmul.f32 0.5, %v1158_v34 }
 0x1ae   : > { %1351 = vmatpush.msrb.mxu0 %v1236_v2  ;;  %v1207_v17 = vmul.f32 0.5, %v1175_v13  ;;  %v1230_v61 = vmul.f32 %v1198_v58, %v2484_v62  ;;  %v1223_v51 = vmul.f32 %v1191_v37, %v2480_v9  ;;  %v1253_v62 = vpop.permute.xlu2 %1252 }
 0x1af   : > { %1371 = vmatpush.msrb.mxu1 %v1237_v35  ;;  %v1199_v21 = vmul.f32 0.5, %v1167_v27  ;;  %v1238_v63 = vmul.f32 %v1206_v19, %v2489_v24  ;;  %v1222_v25 = vmul.f32 %v1190_v45, %v2475_v28 }
 0x1b0   : > { %1352 = vmatpush.msrb.mxu0 %v1228_v43  ;;  %v1239_v46 = vmul.f32 %v1207_v17, %v2495_v26 }
 0x1b1   : > { %v1770_v10 = vpop.eup %1769  ;;  %1372 = vmatpush.msrb.mxu1 %v1229_v23  ;;  %v1231_v50 = vmul.f32 %v1199_v21, %v2500_v44 }
 0x1b2   : > { %v1772_v11 = vpop.eup %1771  ;;  %v1182_v47 = vadd.f32 1.0, %v1770_v10  ;;  %1353 = vmatpush.msrb.mxu0 %v1220_v6 }
 0x1b3   : > { %v1183_v0 = vadd.f32 1.0, %v1772_v11  ;;  %1373 = vmatpush.msrb.mxu1 %v1221_v40  ;;  %1590 = vmatmul.msk.f32.vlgmr.msrb.gmra.mxu0 %vm843_vm9, %v2429_v42 }
 0x1b4   : > { %v1214_v36 = vmul.f32 0.5, %v1182_v47  ;;  %1591 = vmatmul.msk.f32.vlgmr.msrb.gmra.mxu1 %vm843_vm9, %v2429_v42 }
 0x1b5   : > { %v1215_v18 = vmul.f32 0.5, %v1183_v0 }
 0x1b6   : > { %v1246_v31 = vmul.f32 %v1214_v36, %v1057_v12 }
 0x1b7   : > { %v1247_v33 = vmul.f32 %v1215_v18, %v1086_v8 }
 0x1b8   : > { %1390 = vmatpush.msrb.mxu2 %v1246_v31 }
 0x1b9   : > { %1410 = vmatpush.msrb.mxu3 %v1247_v33 }
 0x1ba   : > { %1391 = vmatpush.msrb.mxu2 %v1238_v63 }
 0x1bb   : > { %1411 = vmatpush.msrb.mxu3 %v1239_v46 }
 0x1bc   : > { %1392 = vmatpush.msrb.mxu2 %v1230_v61 }
 0x1bd   : > { %1412 = vmatpush.msrb.mxu3 %v1231_v50 }
 0x1be   : > { %1393 = vmatpush.msrb.mxu2 %v1222_v25 }
 0x1bf   : > { %1413 = vmatpush.msrb.mxu3 %v1223_v51  ;;  %1592 = vmatmul.msk.f32.vlgmr.msrb.gmra.mxu2 %vm843_vm9, %v2429_v42 }
 0x1c0   : > { %1593 = vmatmul.msk.f32.vlgmr.msrb.gmra.mxu3 %vm843_vm9, %v2429_v42 }
 0x20f   : > { %v1275_v24 = vpop.f32.mrf.mxu0 }
 0x210   : > { %v1295_v26 = vpop.f32.mrf.mxu1  ;;  %v1276_v28 = vadd.f32 %v1275_v24, %v1253_v62 }
 0x211   : > { %v1296_v44 = vadd.f32 %v1295_v26, %v1253_v62 }
 0x213   : > { %v1426_v32 = vrot.slane %v1296_v44, 4 }
 0x215   : > { %v1431_v9 = vsel %vm1430_vm10, %v1276_v28, %v1426_v32 }
 0x216   : > { %1439 = vst [vmem:[%s270_s13] sm:$0xff] %v1431_v9 }
 0x221   : > { %v1315_v49 = vpop.f32.mrf.mxu2 }
 0x222   : > { %v1335_v4 = vpop.f32.mrf.mxu3  ;;  %v1316_v12 = vadd.f32 %v1315_v49, %v1253_v62 }
 0x223   : > { %v1336_v16 = vadd.f32 %v1335_v4, %v1253_v62 }
 0x225   : > { %v1427_v42 = vrot.slane %v1336_v16, 4 }
 0x227   : > { %v1432_v8 = vsel %vm1430_vm10, %v1316_v12, %v1427_v42 }
 0x228   : > { %1440 = vst [vmem:[%s270_s13 + $0x8] sm:$0xff] %v1432_v8 }
 0x230   : > { %v1355_v39 = vpop.f32.mrf.mxu0 }
 0x231   : > { %v1375_v48 = vpop.f32.mrf.mxu1  ;;  %v1356_v53 = vadd.f32 %v1355_v39, %v1253_v62 }
 0x232   : > { %v1376_v52 = vadd.f32 %v1375_v48, %v1253_v62 }
 0x234   : > { %v1428_v56 = vrot.slane %v1376_v52, 4 }
 0x236   : > { %v1433_v1 = vsel %vm1430_vm10, %v1356_v53, %v1428_v56 }
 0x237   : > { %1441 = vst [vmem:[%s270_s13 + $0x10] sm:$0xff] %v1433_v1 }
 0x242   : > { %v1395_v54 = vpop.f32.mrf.mxu2 }
 0x243   : > { %v1415_v57 = vpop.f32.mrf.mxu3  ;;  %v1396_v59 = vadd.f32 %v1395_v54, %v1253_v62 }
 0x244   : > { %v1416_v38 = vadd.f32 %v1415_v57, %v1253_v62 }
 0x246   : > { %v1429_v55 = vrot.slane %v1416_v38, 4 }
 0x248   : > { %v1434_v30 = vsel %vm1430_vm10, %v1396_v59, %v1429_v55 }
 0x249   : > { %1442 = vst [vmem:[%s270_s13 + $0x18] sm:$0xff] %v1434_v30 }
 0x24a   : > { %1800 = shalt.err (!%p1797_p3)
}
 0x24b   : > { %1600 = dma.vmem_to_hbm [thread:$0]  (%p1916_p5), %s1458_s18, 512, %s1460_s19, %s1444_s20  }
 0x24c PF: > { %p1606_p4 = scmp.ge.s32.totalorder %s1835_s27, 2  ;;  %s1471_s8 = sand.u32 1, %s1823_s24  }
 0x24d   : > { %s1472_s13 = scalar_lea.sflag [#allocation3], %s1471_s8 }
 0x24e   : > { %p1603_p7 = pnand %p1606_p4, %p1920_p6 }
 0x250   : > { %p1604_p8 = pneg %p1603_p7 }
 0x252   : > { %1818 = dma.done.wait (%p1604_p8), %s1472_s13, 512  }
 0x253   : > { %1820 = vsyncadd (%p1604_p8), %s1472_s13, 4294966784  ;;  %p17_p9 = scmp.ge.s32.totalorder %s1903_s30, 4   ;;  %s2580_s24 = smov %s1827_s25 }
 0x254   : > { %s2581_s25 = smov %s1831_s26  ;;  %s2582_s26 = smov %s1914_s10 }
 0x255   : > { %s2583_s27 = smov %s1903_s30  ;;  %19 = sbr.rel (!%p17_p9) target bundleno = 3 (0x3), region = 83 }
 0x25a   :  { %1478 = vsyncpa [#allocation3], 1 }
 0x25b   :  { %1480 = vsyncpa [#allocation3 + $0x1], 1 }

</bundles_post_ra>
